<compile_context>
chip_gen: v6e
topology: v6e:2x2x1
jax: 0.10.0
libtpu: 0.0.40
codegen_flags: <defaults>
</compile_context>

<pallas_src>
import functools

import jax
import jax.numpy as jnp
import numpy as np
from jax.experimental import pallas as pl
from jax.experimental.pallas import tpu as pltpu


def _patcher_kernel(x_ref, pw_ref, o_ref):
    """kb patch-row bands of one image: (1, C, kb*p, W) -> (1, kb, PW, C)."""
    _, kb, PW, C = o_ref.shape
    p = x_ref.shape[2] // kb

    # Per-band p-row sums, accumulated in f32 even for bf16 inputs, stacked
    # band-major so a single MXU matmul pools the columns for every band.
    band_sums = []
    for band in range(kb):                                   # kb is small & static
        xb = x_ref[0, :, band * p:(band + 1) * p, :].astype(jnp.float32)  # (C, p, W)
        band_sums.append(jnp.sum(xb, axis=1))                              # (C, W)
    rs = band_sums[0] if kb == 1 else jnp.concatenate(band_sums, axis=0)   # (kb*C, W)

    # Column pooling: pw carries the 1/(p*p) scale and zero rows for the
    # trailing columns dropped by AvgPool2d's floor division.
    pooled = jnp.dot(rs, pw_ref[...], preferred_element_type=jnp.float32)  # (kb*C, PW)

    # Lane-dense store: transpose each tiny (C, PW) band result so C lands on
    # the 128-lane axis of the (B, PH, PW, C) output.
    for band in range(kb):
        o_ref[0, band] = pooled[band * C:(band + 1) * C, :].T.astype(o_ref.dtype)


def patcher(x_nchw, patch_size=16):
    """AvgPool2d(p, stride=p, padding=0) + flatten(2) + transpose(1, 2).

    x_nchw: (B, C, H, W), any float dtype.  Returns (B, (H//p)*(W//p), C)
    in the input dtype.
    """
    B, C, H, W = x_nchw.shape
    p = int(patch_size)
    PH, PW = H // p, W // p
    assert PH >= 1 and PW >= 1, "patch_size larger than the input"

    itemsize = jnp.dtype(x_nchw.dtype).itemsize
    sublane = {4: 8, 2: 16, 1: 32}.get(itemsize, 8)

    # Choose kb = number of fused patch-row bands per grid step.  The input
    # block is (1, C, kb*p, W); its second-to-last dim must be sublane-aligned
    # (or cover H exactly).
    legal = [d for d in range(1, PH + 1)
             if PH % d == 0 and ((d * p) % sublane == 0 or d * p == H)]
    if not legal:
        # TODO(synk): non-sublane-aligned patch sizes need a full-H block path.
        raise ValueError(
            f"patch_size={p} needs kb*p to be a multiple of {sublane} or == H")
    budget_elems = (4 << 20) // 4          # ~4 MiB of f32-wide working set / block
    fit = [d for d in legal if d * C * p * W <= budget_elems and d <= 16] or [legal[0]]
    kb = max(fit)
    for d in sorted(fit, reverse=True):    # keep >= 2 grid steps for megacore (v7x)
        if B * (PH // d) >= 2:
            kb = d
            break

    # (W, PW) averaging matrix: 1/(p*p) where w // p == q; zero rows for the
    # trailing columns dropped by floor division (ragged W).
    pw_np = np.zeros((W, PW), np.float32)
    cols = np.arange(PW * p)
    pw_np[cols, cols // p] = 1.0 / (p * p)
    pw_mat = jnp.asarray(pw_np)

    flops = B * C * PH * p * W + 2 * B * C * PH * W * PW      # row sums + matmuls
    bytes_accessed = (itemsize * B * C * PH * p * W            # input actually read
                      + 4 * W * PW
                      + itemsize * B * PH * PW * C)

    pooled = pl.pallas_call(
        _patcher_kernel,
        out_shape=jax.ShapeDtypeStruct((B, PH, PW, C), x_nchw.dtype),
        grid=(B, PH // kb),
        in_specs=[
            pl.BlockSpec((1, C, kb * p, W), lambda b, k: (b, 0, k, 0)),
            pl.BlockSpec((W, PW), lambda b, k: (0, 0)),
        ],
        out_specs=pl.BlockSpec((1, kb, PW, C), lambda b, k: (b, k, 0, 0)),
        compiler_params=pltpu.CompilerParams(
            dimension_semantics=("parallel", "parallel")),
        cost_estimate=pl.CostEstimate(
            flops=flops, transcendentals=0, bytes_accessed=bytes_accessed),
    )(x_nchw, pw_mat)

    # flatten(2).transpose(1, 2): output is already (B, PH, PW, C), so this is
    # a pure-metadata reshape.
    return pooled.reshape(B, PH * PW, C)


def _ref_patcher(x, p):
    """Pure-JAX reference (AvgPool2d + flatten(2) + transpose(1, 2)), f32."""
    B, C, H, W = x.shape
    PH, PW = H // p, W // p
    xf = x.astype(jnp.float32)
    pooled = xf[:, :, :PH * p, :PW * p].reshape(B, C, PH, p, PW, p).mean(axis=(3, 5))
    return pooled.reshape(B, C, PH * PW).transpose(0, 2, 1)


if __name__ == "__main__":
    key = jax.random.PRNGKey(0)
    k1, k2, k3 = jax.random.split(key, 3)
    p = 16

    # Main case: B=2, C=4, 32x32, patch_size=16 -> (2, 4 patches, 4 channels).
    B, C, H, W = 2, 4, 32, 32
    x = jax.random.normal(k1, (B, C, H, W), jnp.float32)
    fn = jax.jit(functools.partial(patcher, patch_size=p))
    out = jax.block_until_ready(fn(x))
    assert out.shape == (B, (H // p) * (W // p), C), out.shape
    err = float(jnp.max(jnp.abs(out - _ref_patcher(x, p))))
    assert err < 1e-4, err

    # Ragged case (floor semantics of AvgPool2d): 48x40 with patch 16 -> 3x2.
    B2, C2, H2, W2 = 2, 3, 48, 40
    x2 = jax.random.normal(k2, (B2, C2, H2, W2), jnp.float32)
    out2 = jax.block_until_ready(
        jax.jit(functools.partial(patcher, patch_size=p))(x2))
    assert out2.shape == (B2, (H2 // p) * (W2 // p), C2), out2.shape
    err2 = float(jnp.max(jnp.abs(out2 - _ref_patcher(x2, p))))
    assert err2 < 1e-4, err2

    # bf16 input stays bf16 in HBM (no wrapper cast); accumulation is f32.
    x3 = jax.random.normal(k3, (B, C, H, W), jnp.bfloat16)
    out3 = jax.block_until_ready(
        jax.jit(functools.partial(patcher, patch_size=p))(x3))
    assert out3.dtype == jnp.bfloat16
    assert out3.shape == (B, (H // p) * (W // p), C), out3.shape
    err3 = float(jnp.max(jnp.abs(out3.astype(jnp.float32) - _ref_patcher(x3, p))))
    assert err3 < 1e-2, err3

    assert bool(jnp.all(jnp.isfinite(out))) and bool(jnp.all(jnp.isfinite(out2)))
    print("KERNEL_OK")
</pallas_src>

<mosaic_0001>
module attributes {stable_mosaic.version = 11 : i64} {
  func.func @_patcher_kernel(%arg0: i32, %arg1: i32, %arg2: memref<1x4x32x32xf32, #tpu.memory_space<vmem>>, %arg3: memref<32x2xf32, #tpu.memory_space<vmem>>, %arg4: memref<1x2x2x4xf32, #tpu.memory_space<vmem>>) attributes {dimension_semantics = [#tpu.dimension_semantics<parallel>, #tpu.dimension_semantics<parallel>], iteration_bounds = array<i64: 2, 1>, scalar_prefetch = 0 : i64, scratch_operands = 0 : i64, tpu.core_type = #tpu.core_type<tc>, window_params = [{transform_indices = @transform_0, window_bounds = array<i64: 1, 4, 32, 32>}, {pipeline_mode = #tpu.pipeline_mode<synchronous>, transform_indices = @transform_1, window_bounds = array<i64: 32, 2>}, {transform_indices = @transform_2, window_bounds = array<i64: 1, 2, 2, 4>}]} {
    %c0 = arith.constant 0 : index
    %c0_0 = arith.constant 0 : index
    %c0_1 = arith.constant 0 : index
    %c0_2 = arith.constant 0 : index
    %0 = vector.load %arg2[%c0, %c0_0, %c0_1, %c0_2] : memref<1x4x32x32xf32, #tpu.memory_space<vmem>>, vector<1x4x16x32xf32>
    %1 = vector.shape_cast %0 : vector<1x4x16x32xf32> to vector<4x16x32xf32>
    %cst = arith.constant dense<0.000000e+00> : vector<4x32xf32>
    %2 = vector.multi_reduction <add>, %1, %cst [1] : vector<4x16x32xf32> to vector<4x32xf32>
    %c0_3 = arith.constant 0 : index
    %c0_4 = arith.constant 0 : index
    %c16 = arith.constant 16 : index
    %c0_5 = arith.constant 0 : index
    %3 = vector.load %arg2[%c0_3, %c0_4, %c16, %c0_5] : memref<1x4x32x32xf32, #tpu.memory_space<vmem>>, vector<1x4x16x32xf32>
    %4 = vector.shape_cast %3 : vector<1x4x16x32xf32> to vector<4x16x32xf32>
    %cst_6 = arith.constant dense<0.000000e+00> : vector<4x32xf32>
    %5 = vector.multi_reduction <add>, %4, %cst_6 [1] : vector<4x16x32xf32> to vector<4x32xf32>
    %6 = tpu.concatenate %2, %5 in 0 : vector<4x32xf32>, vector<4x32xf32> -> vector<8x32xf32>
    %c0_7 = arith.constant 0 : index
    %c0_8 = arith.constant 0 : index
    %7 = vector.load %arg3[%c0_7, %c0_8] : memref<32x2xf32, #tpu.memory_space<vmem>>, vector<32x2xf32>
    %cst_9 = arith.constant dense<0.000000e+00> : vector<8x2xf32>
    %8 = tpu.matmul %6, %7, %cst_9 {dimension_numbers = #tpu.dot_dimension_numbers<[1], [0], [0], [1], [0, 0, 1, 1], [], []>} : vector<8x32xf32>, vector<32x2xf32>, vector<8x2xf32> -> vector<8x2xf32>
    %9 = vector.extract_strided_slice %8 {offsets = [0, 0], sizes = [4, 2], strides = [1, 1]} : vector<8x2xf32> to vector<4x2xf32>
    %10 = tpu.transpose %9, [1, 0] : vector<4x2xf32> -> vector<2x4xf32>
    %c0_10 = arith.constant 0 : index
    %c0_11 = arith.constant 0 : index
    %c0_12 = arith.constant 0 : index
    %c0_13 = arith.constant 0 : index
    %11 = vector.load %arg4[%c0_10, %c0_11, %c0_12, %c0_13] : memref<1x2x2x4xf32, #tpu.memory_space<vmem>>, vector<1x1x2x4xf32>
    %12 = vector.shape_cast %11 : vector<1x1x2x4xf32> to vector<2x4xf32>
    %13 = vector.shape_cast %10 : vector<2x4xf32> to vector<1x1x2x4xf32>
    tpu.vector_store %arg4[%c0_10, %c0_11, %c0_12, %c0_13], %13 {strides = array<i32>} : memref<1x2x2x4xf32, #tpu.memory_space<vmem>>, vector<1x1x2x4xf32>,
    %14 = vector.extract_strided_slice %8 {offsets = [4, 0], sizes = [4, 2], strides = [1, 1]} : vector<8x2xf32> to vector<4x2xf32>
    %15 = tpu.transpose %14, [1, 0] : vector<4x2xf32> -> vector<2x4xf32>
    %c0_14 = arith.constant 0 : index
    %c1 = arith.constant 1 : index
    %c0_15 = arith.constant 0 : index
    %c0_16 = arith.constant 0 : index
    %16 = vector.load %arg4[%c0_14, %c1, %c0_15, %c0_16] : memref<1x2x2x4xf32, #tpu.memory_space<vmem>>, vector<1x1x2x4xf32>
    %17 = vector.shape_cast %16 : vector<1x1x2x4xf32> to vector<2x4xf32>
    %18 = vector.shape_cast %15 : vector<2x4xf32> to vector<1x1x2x4xf32>
    tpu.vector_store %arg4[%c0_14, %c1, %c0_15, %c0_16], %18 {strides = array<i32>} : memref<1x2x2x4xf32, #tpu.memory_space<vmem>>, vector<1x1x2x4xf32>,
    return
  }
  func.func @transform_0(%arg0: i32, %arg1: i32) -> (i32, i32, i32, i32) {
    %c0_i32 = arith.constant 0 : i32
    %c0_i32_0 = arith.constant 0 : i32
    %c0_i32_1 = arith.constant 0 : i32
    return %arg0, %c0_i32, %arg1, %c0_i32_0 : i32, i32, i32, i32
  }
  func.func @transform_1(%arg0: i32, %arg1: i32) -> (i32, i32) {
    %c0_i32 = arith.constant 0 : i32
    %c0_i32_0 = arith.constant 0 : i32
    %c0_i32_1 = arith.constant 0 : i32
    return %c0_i32, %c0_i32_0 : i32, i32
  }
  func.func @transform_2(%arg0: i32, %arg1: i32) -> (i32, i32, i32, i32) {
    %c0_i32 = arith.constant 0 : i32
    %c0_i32_0 = arith.constant 0 : i32
    %c0_i32_1 = arith.constant 0 : i32
    return %arg0, %arg1, %c0_i32, %c0_i32_0 : i32, i32, i32, i32
  }
}

</mosaic_0001>

<bundles_post_ra>
// kernel: patcher.1
= control target key start
LH: loop header
LB: loop body
LE: loop exit
PB: predicated region body
PF: predicated region fallthrough
CT: control target
= control target key end

     0   :  { %7 = vsyncpa [#allocation3], 0  ;;  %s1074_s0 = inlined_call_operand.hbm [shape: f32[2,4,32,32], index: 0, kind: input, shape index: {}]   ;;  %s1075_s1 = inlined_call_operand.hbm [shape: f32[32,2], index: 1, kind: input, shape index: {}]   ;;  %s1076_s2 = inlined_call_operand.hbm [shape: f32[2,2,2,4], index: 2, kind: output, shape index: {}]  }
   0x1   :  { %9 = vsyncpa [#allocation3 + $0x1], 0 }
   0x2   :  { %10 = vsyncpa [#allocation6], 0 }
   0x3   :  { %11 = vsyncpa [#allocation4], 0 }
   0x4   :  { %13 = vsyncpa [#allocation4 + $0x1], 0  ;;  %s851_s9 = smov 0   ;;  %s853_s10 = smov 0  }
   0x5   :  { %s855_s11 = smov 0   ;;  %s857_s12 = smov 0  }
   0x6   :  { %s859_s13 = smov 0   ;;  %s861_s14 = smov 0  }
   0x7 LB: > { %s571_s15 = sadd.s32 4294967295, %s825_s14   ;;  %s572_s16 = sadd.s32 4294967294, %s825_s14   ;;  %s825_s14 = sphi %s861_s14, %s19_s14   ;;  %s821_s13 = sphi %s859_s13, %s1096_s13   ;;  %s817_s12 = sphi %s857_s12, %s1095_s12   ;;  %s813_s11 = sphi %s855_s11, %s1094_s11   ;;  %s809_s10 = sphi %s853_s10, %s1093_s10   ;;  %s805_s9 = sphi %s851_s9, %s1092_s9  }
   0x8   : > { %p53_p0 = scmp.ne.s32.totalorder %s809_s10, %s805_s9  ;;  %p885_p1 = scmp.eq.s32.totalorder %s571_s15, 0 }
   0x9   : > { %p889_p2 = scmp.eq.s32.totalorder %s571_s15, 1  ;;  %p106_p3 = scmp.eq.s32.totalorder %s572_s16, 1 }
   0xa   : > { %p895_p4 = por %p885_p1, %p53_p0  ;;  %p573_p5 = scmp.ge.s32.totalorder %s825_s14, 1 }
   0xb   : > { %p900_p6 = por %p106_p3, %p53_p0  ;;  %p113_p7 = scmp.lt.s32.totalorder %s825_s14, 3 }
   0xc   : > { %s1081_s19 = scalar_select %p895_p4, 1, 0 }
   0xd   : > { %s1082_s20 = scalar_select %p900_p6, 1, 0 }
   0xe   : > { %p905_p8 = pnand %p573_p5, %p113_p7  ;;  %s827_s22 = smov [#allocation5]  }
   0xf   : > { %s125_s23 = sshll.u32 %s827_s22, 4  ;;  %s31_s25 = sadd.s32 1, %s821_s13  ;;  %s126_s23 = int_to_ptr.vmem [resolvable:$true] %s125_s23 }
  0x10   : > { %p616_p9 = pneg %p905_p8  ;;  %s698_s26 = scalar_lea.vmem %s126_s23, 512 }
  0x11   : > { %p699_p13 = scmp.ne.s32.totalorder %s126_s23, %s698_s26  ;;  %p706_p5 = scmp.lt.s32.totalorder %s126_s23, %s126_s23 }
  0x12   : > { %p914_p11 = pnand %p616_p9, %p885_p1  ;;  %p707_p7 = scmp.lt.s32.totalorder %s698_s26, %s698_s26 }
  0x14   : > { %p689_p12 = pneg %p914_p11  ;;  %p708_p6 = por %p707_p7, %p706_p5 }
  0x16   : > { %p701_p0 = pnand %p699_p13, %p689_p12 }
  0x18   : > { %p702_p3 = pneg %p701_p0 }
  0x1a   : > { %p709_p4 = pnand %p708_p6, %p702_p3 }
  0x1c   : > { %712 = shalt.err (!%p709_p4)
}
  0x1d   : > { %s1078_s27 = smov 128   ;;  %s829_s28 = smov 8  }
  0x1e   : > { %619 = dma.hbm_to_vmem [thread:$0]  (!%p914_p11), %s1075_s1, 512, %s126_s23, [#allocation6], %s1078_s27, %s1078_s27, %s829_s28  }
  0x1f   : > { %p33_p4 = scmp.ge.s32.totalorder %s31_s25, 2  ;;  %s40_s3 = sadd.s32 1, %s813_s11 }
  0x20   : > { %p47_p6 = scmp.ne.s32.totalorder %s813_s11, %s809_s10  ;;  %p48_p9 = scmp.eq.s32.totalorder %s825_s14, 0 }
  0x21   : > { %s1098_s25 = smov (%p33_p4, %s31_s25), 0  ;;  %p629_p0 = scmp.lt.s32.totalorder %s825_s14, 2 }
  0x22   : > { %p935_p12 = por %p48_p9, %p47_p6  ;;  %p941_p13 = por %p889_p2, %p47_p6 }
  0x23   : > { %s35_s6 = ssub.s32 %s821_s13, %s1098_s25  ;;  %s139_s7 = sand.u32 1, %s813_s11  }
  0x24   : > { %p38_p11 = scmp.eq.s32.totalorder %s35_s6, 0  ;;  %s576_s8 = sshll.u32 %s139_s7, 7 }
  0x25   : > { %s590_s16 = sshll.u32 %s821_s13, 11  ;;  %s143_s26 = scalar_lea.vmem [#allocation2], %s576_s8 }
  0x26   : > { %s950_s15 = scalar_select %p38_p11, %s813_s11, %s40_s3  }
  0x27   : > { %s151_s24 = scalar_lea.hbm %s1074_s0, %s590_s16  ;;  %s152_s29 = sshll.u32 %s143_s26, 4  ;;  %s153_s29 = int_to_ptr.vmem [resolvable:$true] %s152_s29 }
  0x28   : > { %p958_p2 = pnand %p629_p0, %p935_p12  ;;  %s140_s30 = scalar_lea.sflag [#allocation3], %s139_s7 }
  0x29   : > { %s726_s6 = scalar_lea.vmem %s153_s29, 2048  ;;  %s830_s3 = smov [#allocation2]  }
  0x2a   : > { %p715_p3 = pneg %p958_p2  ;;  %p727_p5 = scmp.ne.s32.totalorder %s153_s29, %s726_s6 }
  0x2b   : > { %s731_s27 = sshll.u32 %s830_s3, 4  ;;  %s732_s27 = int_to_ptr.vmem [resolvable:$false] %s731_s27 }
  0x2c   : > { %p729_p7 = pnand %p727_p5, %p715_p3  ;;  %s733_s16 = scalar_lea.vmem %s732_s27, 4096 }
  0x2d   : > { %p734_p6 = scmp.lt.s32.totalorder %s153_s29, %s732_s27  ;;  %p735_p9 = scmp.lt.s32.totalorder %s733_s16, %s726_s6 }
  0x2e   : > { %p730_p4 = pneg %p729_p7 }
  0x2f   : > { %p736_p11 = por %p735_p9, %p734_p6 }
  0x31   : > { %p737_p10 = pnand %p736_p11, %p730_p4 }
  0x33   : > { %740 = shalt.err (!%p737_p10)
}
  0x34   : > { %s1088_s4 = smov 128   ;;  %164 = sbr.rel (%p905_p8) target bundleno = 427 (0x1ab), region = 28 }
  0x35   : > { %623 = dma.hbm_to_vmem [thread:$0]  (!%p958_p2), %s151_s24, 2048, %s153_s29, %s140_s30, %s1088_s4, %s1088_s4, %s829_s28  }
  0x36   : > { %s972_s7 = sand.u32 (!%p905_p8), 1, %s809_s10   ;;  %p1089_p10 = scmp.ne.s32.totalorder (!%p905_p8), %s1081_s19, 0 }
  0x37   : > { %s580_s27 = sshll.u32 (!%p905_p8), %s972_s7, 7  ;;  %s167_s8 = scalar_lea.sflag (!%p905_p8), [#allocation3], %s972_s7 }
  0x38   : > { %s976_s22 = scalar_lea.vmem (!%p905_p8), [#allocation2], %s580_s27 }
  0x39   : > { %792 = dma.done.wait (%p1089_p10), %s167_s8, 2048  }
  0x3a   : > { %794 = vsyncadd (%p1089_p10), %s167_s8, 4294965248 }
  0x3b   : > { %796 = dma.done.wait (%p885_p1), [#allocation6], 512  }
  0x3c   : > { %798 = vsyncadd (%p885_p1), [#allocation6], 4294966784  ;;  %v831_v0 = vmov 0.0   ;;  %vm832_vm0 = vmmov 0   ;;  %vm205_vm1 = vcmask 261120   ;;  %v313_v1 = vld [vmem:[#allocation5 + $0x18] sm:$0xff] }
  0x3d   : > { %597 = vmatprep.subr.mxu0 %v831_v0  ;;  %605 = vmatprep.mubr.msk.f32.mxu0 %vm832_vm0, %v831_v0  ;;  %v312_v2 = vld [vmem:[#allocation5 + $0x10] sm:$0xff]  ;;  %v311_v3 = vld [vmem:[#allocation5 + $0x8] sm:$0xff]  ;;  %v197_v4 = vld [vmem:[%s976_s22] sm:$0xff]  ;;  %vm290_vm2 = vcmask 1041409   ;;  %vm292_vm3 = vcmask 1042434   ;;  %vm301_vm4 = vcmask 1045509  }
  0x3e   : > { %598 = vmatpush3.msra.mxu0 %v313_v1  ;;  %v198_v5 = vld [vmem:[%s976_s22 + $0x8] sm:$0xff]  ;;  %v310_v6 = vld [vmem:[#allocation5] sm:$0xff]  ;;  %v206_v10 = vsel %vm205_vm1, %v197_v4, 0.0  ;;  %v242_v23 = vld [vmem:[%s976_s22 + $0x10] sm:$0xff]  ;;  %vm303_vm5 = vcmask 1046534   ;;  %vm294_vm6 = vcmask 1043459  }
  0x3f   : > { %599 = vmatprep.subr.mxu0 %v831_v0  ;;  %v199_v7 = vld [vmem:[%s976_s22 + $0x20] sm:$0xff]  ;;  %v200_v8 = vld [vmem:[%s976_s22 + $0x28] sm:$0xff]  ;;  %v207_v11 = vsel %vm205_vm1, %v198_v5, 0.0  ;;  %v243_v24 = vld [vmem:[%s976_s22 + $0x18] sm:$0xff]  ;;  %v250_v32 = vsel %vm205_vm1, %v242_v23, 0.0  ;;  %vm305_vm7 = vcmask 1047559  }
  0x40   : > { %v201_v9 = vld [vmem:[%s976_s22 + $0x40] sm:$0xff]  ;;  %600 = vmatpush3.msra.mxu0 %v312_v2  ;;  %v202_v12 = vld [vmem:[%s976_s22 + $0x48] sm:$0xff]  ;;  %v208_v15 = vadd.f32 %v207_v11, %v206_v10  ;;  %v215_v16 = vsel %vm205_vm1, %v199_v7, 0.0  ;;  %v216_v17 = vsel %vm205_vm1, %v200_v8, 0.0  ;;  %v244_v25 = vld [vmem:[%s976_s22 + $0x30] sm:$0xff]  ;;  %v251_v34 = vsel %vm205_vm1, %v243_v24, 0.0 }
  0x41   : > { %v203_v13 = vld [vmem:[%s976_s22 + $0x60] sm:$0xff]  ;;  %v204_v14 = vld [vmem:[%s976_s22 + $0x68] sm:$0xff]  ;;  %v224_v18 = vsel %vm205_vm1, %v201_v9, 0.0  ;;  %601 = vmatprep.subr.mxu0 %v831_v0  ;;  %v217_v19 = vadd.f32 %v216_v17, %v215_v16  ;;  %v225_v20 = vsel %vm205_vm1, %v202_v12, 0.0  ;;  %v245_v29 = vld [vmem:[%s976_s22 + $0x38] sm:$0xff]  ;;  %v259_v35 = vsel %vm205_vm1, %v244_v25, 0.0 }
  0x42   : > { %v233_v21 = vsel %vm205_vm1, %v203_v13, 0.0  ;;  %v234_v22 = vsel %vm205_vm1, %v204_v14, 0.0  ;;  %602 = vmatpush3.msra.mxu0 %v311_v3  ;;  %v209_v26 = vrot.slane %v208_v15, 4  ;;  %v226_v27 = vadd.f32 %v225_v20, %v224_v18  ;;  %v246_v30 = vld [vmem:[%s976_s22 + $0x50] sm:$0xff]  ;;  %v247_v31 = vld [vmem:[%s976_s22 + $0x58] sm:$0xff]  ;;  %s582_s17 = sshll.u32 %s972_s7, 2 }
  0x43   : > { %v235_v28 = vadd.f32 %v234_v22, %v233_v21  ;;  %603 = vmatprep.subr.mxu0 %v831_v0  ;;  %v218_v33 = vrot.slane %v217_v19, 4  ;;  %v260_v36 = vsel %vm205_vm1, %v245_v29, 0.0  ;;  %v248_v40 = vld [vmem:[%s976_s22 + $0x70] sm:$0xff]  ;;  %v252_v41 = vadd.f32 %v251_v34, %v250_v32  ;;  %v249_v49 = vld [vmem:[%s976_s22 + $0x78] sm:$0xff]  ;;  %s194_s19 = scalar_lea.vmem [#allocation7], %s582_s17  ;;  %s591_s28 = sshll.u32 %s817_s12, 6 }
  0x44   : > { %604 = vmatpush3.msra.mxu0 %v310_v6  ;;  %v210_v37 = vadd.f32 %v209_v26, %v208_v15  ;;  %v227_v38 = vrot.slane %v226_v27, 4  ;;  %v261_v43 = vadd.f32 %v260_v36, %v259_v35  ;;  %v268_v44 = vsel %vm205_vm1, %v246_v30, 0.0  ;;  %s474_s21 = sshll.u32 %s194_s19, 4  ;;  %s1026_s26 = scalar_lea.hbm %s1076_s2, %s591_s28  ;;  %s1021_s21 = int_to_ptr.vmem [resolvable:$true] %s474_s21 }
  0x45   : > { %v236_v39 = vrot.slane %v235_v28, 4  ;;  %v219_v42 = vadd.f32 %v218_v33, %v217_v19  ;;  %v269_v45 = vsel %vm205_vm1, %v247_v31, 0.0  ;;  %v253_v50 = vrot.slane %v252_v41, 4  ;;  %s459_s29 = scalar_lea.sflag [#allocation4], %s972_s7  ;;  %s741_s18 = scalar_lea.vmem %s1021_s21, 64 }
  0x46   : > { %v211_v46 = vrot.slane %v210_v37, 2  ;;  %v228_v47 = vadd.f32 %v227_v38, %v226_v27  ;;  %v262_v52 = vrot.slane %v261_v43, 4  ;;  %v270_v53 = vadd.f32 %v269_v45, %v268_v44  ;;  %p742_p1 = scmp.ne.s32.totalorder %s1021_s21, %s741_s18  ;;  %s833_s12 = smov [#allocation7]  }
  0x47   : > { %v237_v48 = vadd.f32 %v236_v39, %v235_v28  ;;  %v220_v51 = vrot.slane %v219_v42, 2  ;;  %v277_v54 = vsel %vm205_vm1, %v248_v40, 0.0  ;;  %v254_v58 = vadd.f32 %v253_v50, %v252_v41  ;;  %s745_s30 = sshll.u32 %s833_s12, 4  ;;  %s746_s30 = int_to_ptr.vmem [resolvable:$false] %s745_s30 }
  0x48   : > { %v212_v55 = vadd.f32 %v211_v46, %v210_v37  ;;  %v229_v56 = vrot.slane %v228_v47, 2  ;;  %v263_v60 = vadd.f32 %v262_v52, %v261_v43  ;;  %v271_v61 = vrot.slane %v270_v53, 4  ;;  %p743_p8 = pnand %p742_p1, %p941_p13  ;;  %s747_s6 = scalar_lea.vmem %s746_s30, 128 }
  0x49   : > { %v238_v57 = vrot.slane %v237_v48, 2  ;;  %v221_v59 = vadd.f32 %v220_v51, %v219_v42  ;;  %v278_v62 = vsel %vm205_vm1, %v249_v49, 0.0  ;;  %v255_v2 = vrot.slane %v254_v58, 2  ;;  %p748_p0 = scmp.lt.s32.totalorder %s1021_s21, %s746_s30  ;;  %p749_p2 = scmp.lt.s32.totalorder %s747_s6, %s741_s18 }
  0x4a   : > { %v213_v63 = vrot.slane %v212_v55, 1  ;;  %v230_v0 = vadd.f32 %v229_v56, %v228_v47  ;;  %v264_v4 = vrot.slane %v263_v60, 2  ;;  %v272_v5 = vadd.f32 %v271_v61, %v270_v53  ;;  %p744_p12 = pneg %p743_p8 }
  0x4b   : > { %v239_v1 = vadd.f32 %v238_v57, %v237_v48  ;;  %v222_v3 = vrot.slane %v221_v59, 1  ;;  %v279_v6 = vadd.f32 %v278_v62, %v277_v54  ;;  %v256_v9 = vadd.f32 %v255_v2, %v254_v58  ;;  %p750_p3 = por %p749_p2, %p748_p0 }
  0x4c   : > { %v214_v7 = vadd.f32 %v213_v63, %v212_v55  ;;  %v231_v8 = vrot.slane %v230_v0, 1  ;;  %v265_v11 = vadd.f32 %v264_v4, %v263_v60  ;;  %v273_v12 = vrot.slane %v272_v5, 2 }
  0x4d   : > { %v223_v10 = vadd.f32 %v222_v3, %v221_v59  ;;  %v280_v13 = vrot.slane %v279_v6, 4  ;;  %v257_v14 = vrot.slane %v256_v9, 1  ;;  %v240_v15 = vrot.slane %v239_v1, 1  ;;  %p751_p5 = pnand %p750_p3, %p744_p12 }
  0x4e   : > { %v266_v16 = vrot.slane %v265_v11, 1  ;;  %v274_v17 = vadd.f32 %v273_v12, %v272_v5  ;;  %v232_v19 = vadd.f32 %v231_v8, %v230_v0  ;;  %vm308_vm8 = vcmask 1043456  }
  0x4f   : > { %v281_v18 = vadd.f32 %v280_v13, %v279_v6  ;;  %v258_v20 = vadd.f32 %v257_v14, %v256_v9  ;;  %v291_v24 = vsel %vm290_vm2, %v223_v10, %v214_v7  ;;  %v241_v25 = vadd.f32 %v240_v15, %v239_v1 }
  0x50   : > { %v267_v21 = vadd.f32 %v266_v16, %v265_v11  ;;  %v275_v22 = vrot.slane %v274_v17, 1  ;;  %v293_v29 = vsel %vm292_vm3, %v232_v19, %v291_v24  ;;  %vm419_vm9 = vcmask 25600  }
  0x51   : > { %v282_v23 = vrot.slane %v281_v18, 2  ;;  %v295_v33 = vsel %vm294_vm6, %v241_v25, %v293_v29 }
  0x52   : > { %v276_v26 = vadd.f32 %v275_v22, %v274_v17  ;;  %v302_v28 = vsel %vm301_vm4, %v267_v21, %v258_v20 }
  0x53   : > { %v283_v27 = vadd.f32 %v282_v23, %v281_v18 }
  0x54   : > { %v304_v31 = vsel %vm303_vm5, %v276_v26, %v302_v28 }
  0x55   : > { %v284_v30 = vrot.slane %v283_v27, 1 }
  0x57   : > { %v285_v32 = vadd.f32 %v284_v30, %v283_v27 }
  0x59   : > { %v306_v34 = vsel %vm305_vm7, %v285_v32, %v304_v31 }
  0x5a   : > { %v309_v35 = vsel %vm308_vm8, %v295_v33, %v306_v34 }
  0x5b   : > { %606 = vmatmul.mubr.msk.f32.vlgmr.msra.gmra.mxu0 %vm205_vm1, %v309_v35 }
 0x11b   : > { %v383_v36 = vpop.f32.mrf.mxu0 }
 0x11c   : > { %387 = vxpose.xlu0.b32.start.end [1/1] (short) (narrow) %v383_v36, 8  ;;  %v422_v38 = vrot.slane %v383_v36, 4 }
 0x11d   : > { %v607_v37 = vpop.f32.mrf.mxu0 }
 0x120   : > { %424 = vxpose.xlu0.b32.start.end [1/1] (short) (narrow) %v422_v38, 8 }
 0x198   : > { %v403_v39 = vpop.trf.xlu0 }
 0x199   : > { %420 = vst.msk [vmem:[%s194_s19] sm:$0x3] %vm419_vm9, %v403_v39 }
 0x19c   : > { %v440_v40 = vpop.trf.xlu0 }
 0x19d   : > { %584 = vst.msk [vmem:[%s194_s19 + $0x2] sm:$0x3] %vm419_vm9, %v440_v40 }
 0x19e   : > { %754 = shalt.err (!%p751_p5)
}
 0x19f   : > { %s755_s3 = scalar_lea.hbm %s1026_s26, 64  ;;  %s759_s27 = scalar_lea.hbm %s1076_s2, 128 }
 0x1a0   : > { %p756_p7 = scmp.ne.s32.totalorder %s1026_s26, %s755_s3  ;;  %p760_p9 = scmp.lt.s32.totalorder %s1026_s26, %s1076_s2 }
 0x1a1   : > { %p761_p11 = scmp.lt.s32.totalorder %s759_s27, %s755_s3 }
 0x1a2   : > { %p757_p4 = pnand %p756_p7, %p941_p13 }
 0x1a3   : > { %p762_p10 = por %p761_p11, %p760_p9 }
 0x1a4   : > { %p758_p6 = pneg %p757_p4 }
 0x1a6   : > { %p763_p1 = pnand %p762_p10, %p758_p6 }
 0x1a8   : > { %766 = shalt.err (!%p763_p1)
}
 0x1a9   : > { %s834_s17 = smov 32   ;;  %s835_s19 = smov 2  }
 0x1aa   : > { %614 = dma.vmem_to_hbm [thread:$0]  (%p941_p13), %s1021_s21, 64, %s1026_s26, %s459_s29, %s834_s17, %s834_s17, %s835_s19  }
 0x1ab PF: > { %s489_s28 = sand.u32 1, %s805_s9   ;;  %p1090_p8 = scmp.ne.s32.totalorder %s1082_s20, 0 }
 0x1ac   : > { %p1091_p12 = scmp.ge.s32.totalorder %s825_s14, 2  ;;  %s490_s23 = scalar_lea.sflag [#allocation4], %s489_s28 }
 0x1ae   : > { %p625_p0 = pnand %p1091_p12, %p1090_p8 }
 0x1b0   : > { %p626_p2 = pneg %p625_p0 }
 0x1b2   : > { %800 = dma.done.wait (%p626_p2), %s490_s23, 64  }
 0x1b3   : > { %802 = vsyncadd (%p626_p2), %s490_s23, 4294967232  ;;  %s19_s14 = sadd.s32 1, %s825_s14   ;;  %s1092_s9 = smov %s809_s10 }
 0x1b4   : > { %p16_p3 = scmp.ge.s32.totalorder %s19_s14, 4   ;;  %s1093_s10 = smov %s813_s11 }
 0x1b5   : > { %s1094_s11 = smov %s950_s15  ;;  %s1095_s12 = smov %s821_s13 }
 0x1b6   : > { %s1096_s13 = smov %s1098_s25  ;;  %18 = sbr.rel (!%p16_p3) target bundleno = 7 (0x7), region = 78 }
 0x1bb   :  { %495 = vsyncpa [#allocation3], 1 }
 0x1bc   :  { %497 = vsyncpa [#allocation3 + $0x1], 1 }
 0x1bd   :  { %498 = vsyncpa [#allocation6], 1 }
 0x1be   :  { %499 = vsyncpa [#allocation4], 1 }
 0x1bf   :  { %501 = vsyncpa [#allocation4 + $0x1], 1 }

</bundles_post_ra>
